<compile_context>
chip_gen: v6e
topology: v6e:2x2x1
jax: 0.10.0
libtpu: 0.0.40
codegen_flags: <defaults>
</compile_context>

<pallas_src>
import functools

import jax
import jax.numpy as jnp
from jax.experimental import pallas as pl
from jax.experimental.pallas import tpu as pltpu


def _summary_diversity_kernel(x_ref, t_ref, w_ref, b_ref, o_ref, *, cast_x_to_bf16):
    # x_ref: (Bt, S, D) VMEM          t_ref: (Bt, S, 1) VMEM (column layout)
    # w_ref: (D, D) whole-array VMEM resident (f32, or bf16 cast once in wrapper)
    # b_ref: (1, 1) SMEM scalar       o_ref: (Bt, S, 1) VMEM (natural column layout)
    bt, s, d = x_ref.shape

    x = x_ref[...]                                   # (Bt, S, D) f32
    t3 = t_ref[...]                                  # (Bt, S, 1) f32
    w = w_ref[...]                                   # (D, D)
    bias = b_ref[0, 0]                               # scalar from SMEM

    # --- One fused MXU matmul over all Bt*S sentence rows ---------------------
    # (Bt, S, D) -> (Bt*S, D) is a layout-preserving leading-dim collapse
    # (S is the full, sublane-aligned sentence dim, so tiles just concatenate).
    xf = x.reshape(bt * s, d)
    if cast_x_to_bf16:
        xf = xf.astype(jnp.bfloat16)                 # per-tile cast; W already bf16
    v1 = jnp.dot(xf, w, preferred_element_type=jnp.float32).reshape(bt, s, d)

    # --- Per-batch diversity term (all in f32) --------------------------------
    v2 = t3 * x                                      # (Bt, S, D) lane-splat broadcast
    v3 = jnp.sum(v2, axis=1, keepdims=True)          # (Bt, 1, D) per-batch sum over S
    v2n = v3 - v2                                    # == -(v2 - v3)

    v = jnp.sum(v1 * v2n, axis=2, keepdims=True)     # (Bt, S, 1) lane reduce over D
    v = jnp.maximum(v + bias, 0.0)                   # relu(. + b)
    o_ref[...] = (t3 * v).astype(o_ref.dtype)        # gate by targets, column store


def _tpu_vmem_capacity_bytes():
    try:
        return int(pltpu.get_tpu_info().vmem_capacity_bytes)
    except Exception:
        return 128 * 1024 * 1024  # v5e/v6e default if the query is unavailable


def _pick_block_batch(B, S, *, row_budget=1024, dual_tc=False):
    """Batches per grid step: a divisor of B that (a) satisfies the sublane rule for
    the (Bt, S, ...) tiles (Bt % 8 == 0 or Bt == B), (b) keeps Bt*S rows within the
    per-step row budget (measured: 512+ rows reach ~85% of HBM roofline), and
    (c) on dual-TC chips only splits into >= 2 steps when each step keeps >= 512
    rows -- otherwise one big step beats the ~600-cycle per-step overhead."""
    legal = [bt for bt in range(1, B + 1)
             if B % bt == 0 and (bt % 8 == 0 or bt == B)]
    in_budget = [bt for bt in legal if bt * S <= max(row_budget, S)]
    pool = in_budget if in_budget else [min(legal)]
    best = max(pool)
    if dual_tc:
        two_step = [bt for bt in pool if B // bt >= 2 and bt * S >= 512]
        if two_step:
            best = max(two_step)
    return best


def _vmem_limit_bytes(bt, S, D, *, n_x_buffers, w_itemsize, vmem_capacity):
    x_bytes = n_x_buffers * bt * S * D * 4            # streamed input tiles
    w_bytes = D * D * w_itemsize                      # VMEM-resident weight (once)
    small = 4 * bt * S * 4                            # targets + output columns
    est = 2 * (x_bytes + w_bytes + small)             # headroom for intermediates
    # Generation-aware cap: ~48 MiB on v7x (64 MiB/TC), ~100 MiB on v5e/v6e (128 MiB).
    cap = 48 * 1024 * 1024 if vmem_capacity <= 80 * 1024 * 1024 else 100 * 1024 * 1024
    return int(min(max(est, 32 * 1024 * 1024), cap))


def summary_diversity(inputs, targets, W, b, *, block_batch=None, use_bf16_matmul=None):
    """Forward pass of SummaryDiversity.

    inputs : (B, S, D) float32   targets: (B, S) float32
    W      : (D, D)    float32   b      : scalar / (1,) / (1, 1) float32
    returns: (B, S)    float32
    """
    inputs = jnp.asarray(inputs, jnp.float32)
    targets = jnp.asarray(targets, jnp.float32)
    W = jnp.asarray(W, jnp.float32)
    b = jnp.asarray(b, jnp.float32).reshape(1, 1)     # tolerate scalar / (1,) bias

    B, S, D = inputs.shape
    assert targets.shape == (B, S)
    assert W.shape == (D, D)
    # TODO(synk): pad S (inputs and targets with zeros) when S % 8 != 0 so the
    # (Bt, S, D) -> (Bt*S, D) collapse stays layout-preserving.
    assert S % 8 == 0, "S must be a multiple of 8 (sublane-aligned)"

    vmem_capacity = _tpu_vmem_capacity_bytes()
    dual_tc = vmem_capacity <= 80 * 1024 * 1024       # v7x: 64 MiB VMEM/TC, 2 TCs

    if use_bf16_matmul is None:
        # HBM-bound at small D (keep f32 bit-exact); bf16 operands only pay off as
        # D grows toward the compute-bound regime.
        use_bf16_matmul = D >= 512

    bt = block_batch if (block_batch is not None and B % block_batch == 0) \
        else _pick_block_batch(B, S, dual_tc=dual_tc)
    num_steps = B // bt

    # W cast hoisted out of the kernel: done once, and halves W's VMEM footprint.
    w_op = W.astype(jnp.bfloat16) if use_bf16_matmul else W
    targets3 = targets.reshape(B, S, 1)               # free; column layout for kernel

    # Deeper input pipelining only pays when there are several grid steps.
    n_x_buffers = 3 if num_steps >= 3 else 2
    if n_x_buffers == 3:
        x_spec = pl.BlockSpec((bt, S, D), lambda i: (i, 0, 0),
                              pipeline_mode=pl.Buffered(3))
    else:
        x_spec = pl.BlockSpec((bt, S, D), lambda i: (i, 0, 0))

    kernel = functools.partial(_summary_diversity_kernel,
                               cast_x_to_bf16=use_bf16_matmul)

    # TODO(synk): for very large D (W exceeds the VMEM cap, ~2x sooner on v7x),
    # tile W along K/N with an inner "arbitrary" grid axis + f32 VMEM accumulator
    # instead of keeping it whole-array resident.
    out = pl.pallas_call(
        kernel,
        out_shape=jax.ShapeDtypeStruct((B, S, 1), jnp.float32),
        grid=(num_steps,),
        in_specs=[
            # Bt batches of sentence embeddings per grid step.
            x_spec,
            # Targets as a (Bt, S, 1) column tile (broadcast over D is a lane splat).
            pl.BlockSpec((bt, S, 1), lambda i: (i, 0, 0)),
            # Whole W resident in VMEM once (constant operand -> single buffer).
            pl.BlockSpec(memory_space=pltpu.MemorySpace.VMEM),
            # Scalar bias in SMEM.
            pl.BlockSpec(memory_space=pltpu.MemorySpace.SMEM),
        ],
        out_specs=pl.BlockSpec((bt, S, 1), lambda i: (i, 0, 0)),
        compiler_params=pltpu.CompilerParams(
            dimension_semantics=("parallel",),
            vmem_limit_bytes=_vmem_limit_bytes(
                bt, S, D, n_x_buffers=n_x_buffers,
                w_itemsize=w_op.dtype.itemsize, vmem_capacity=vmem_capacity),
        ),
    )(inputs, targets3, w_op, b)

    return out.reshape(B, S)                          # squeeze trailing unit dim (free)


def _reference(inputs, targets, W, b):
    # Pure-JAX reference mirroring the PyTorch forward exactly.
    v1 = jnp.matmul(inputs, W)                        # (B, S, D)
    v2 = targets[:, :, None] * inputs                 # (B, S, D)
    v3 = jnp.sum(v2, axis=1, keepdims=True)           # (B, 1, D)
    v2 = -(v2 - v3)
    v = jnp.sum(v1 * v2, axis=2)                      # (B, S)
    v = v + b                                         # broadcast (1, 1)
    v = jax.nn.relu(v)
    return targets * v


if __name__ == "__main__":
    # Small but MXU-shaped: B=32 batches of S=8 sentences with D=128 embeddings.
    # _pick_block_batch collapses this to a SINGLE grid step over the whole
    # (32, 8, 128) tile -> one fused (256, 128) @ (128, 128) MXU matmul, no
    # per-step overhead duplication.
    B, S, D = 32, 8, 128

    key = jax.random.PRNGKey(0)
    k_in, k_tg, k_w, k_b = jax.random.split(key, 4)

    inputs = jax.random.normal(k_in, (B, S, D), dtype=jnp.float32)
    targets = jax.random.uniform(k_tg, (B, S), dtype=jnp.float32)

    # Deterministic parameter init matching torch.rand (uniform [0, 1)).
    W = jax.random.uniform(k_w, (D, D), dtype=jnp.float32)
    b = jax.random.uniform(k_b, (1, 1), dtype=jnp.float32)

    ref = _reference(inputs, targets, W, b)

    # f32 path (auto-default at D=128): matches the reference tightly.
    out = jax.block_until_ready(summary_diversity(inputs, targets, W, b))
    assert out.shape == (B, S)
    assert jnp.allclose(out, ref, atol=2e-3, rtol=2e-3)

    # bf16-operand MXU path (wrapper-cast W, f32 accumulation): loose tolerance
    # for the ~2^-8 bf16 operand rounding over the 128-term dot products.
    out_bf16 = jax.block_until_ready(
        summary_diversity(inputs, targets, W, b, use_bf16_matmul=True))
    assert out_bf16.shape == (B, S)
    assert jnp.allclose(out_bf16, ref, rtol=5e-2, atol=2.0)

    print("KERNEL_OK")
</pallas_src>

<mosaic_0001>
module attributes {stable_mosaic.version = 11 : i64} {
  func.func @_summary_diversity_kernel(%arg0: i32, %arg1: memref<32x8x128xf32, #tpu.memory_space<vmem>>, %arg2: memref<32x8x1xf32, #tpu.memory_space<vmem>>, %arg3: memref<128x128xf32, #tpu.memory_space<vmem>>, %arg4: memref<1x1xf32, #tpu.memory_space<smem>>, %arg5: memref<32x8x1xf32, #tpu.memory_space<vmem>>) attributes {dimension_semantics = [#tpu.dimension_semantics<parallel>], iteration_bounds = array<i64: 1>, scalar_prefetch = 0 : i64, scratch_operands = 0 : i64, tpu.core_type = #tpu.core_type<tc>, window_params = [{transform_indices = @transform_0, window_bounds = array<i64: 32, 8, 128>}, {transform_indices = @transform_1, window_bounds = array<i64: 32, 8, 1>}, {pipeline_mode = #tpu.pipeline_mode<synchronous>, transform_indices = @transform_2, window_bounds = array<i64: 128, 128>}, {transform_indices = @transform_3, window_bounds = array<i64: 1, 1>}, {transform_indices = @transform_4, window_bounds = array<i64: 32, 8, 1>}]} {
    %c0 = arith.constant 0 : index
    %c0_0 = arith.constant 0 : index
    %c0_1 = arith.constant 0 : index
    %0 = vector.load %arg1[%c0, %c0_0, %c0_1] : memref<32x8x128xf32, #tpu.memory_space<vmem>>, vector<32x8x128xf32>
    %c0_2 = arith.constant 0 : index
    %c0_3 = arith.constant 0 : index
    %c0_4 = arith.constant 0 : index
    %1 = vector.load %arg2[%c0_2, %c0_3, %c0_4] : memref<32x8x1xf32, #tpu.memory_space<vmem>>, vector<32x8x1xf32>
    %c0_5 = arith.constant 0 : index
    %c0_6 = arith.constant 0 : index
    %2 = vector.load %arg3[%c0_5, %c0_6] : memref<128x128xf32, #tpu.memory_space<vmem>>, vector<128x128xf32>
    %c0_7 = arith.constant 0 : index
    %c0_8 = arith.constant 0 : index
    %3 = memref.load %arg4[%c0_7, %c0_8] : memref<1x1xf32, #tpu.memory_space<smem>>
    %4 = vector.shape_cast %0 : vector<32x8x128xf32> to vector<256x128xf32>
    %cst = arith.constant dense<0.000000e+00> : vector<256x128xf32>
    %5 = tpu.matmul %4, %2, %cst {dimension_numbers = #tpu.dot_dimension_numbers<[1], [0], [0], [1], [0, 0, 1, 1], [], []>} : vector<256x128xf32>, vector<128x128xf32>, vector<256x128xf32> -> vector<256x128xf32>
    %6 = vector.shape_cast %5 : vector<256x128xf32> to vector<32x8x128xf32>
    %7 = vector.broadcast %1 : vector<32x8x1xf32> to vector<32x8x128xf32>
    %8 = arith.mulf %7, %0 : vector<32x8x128xf32>
    %cst_9 = arith.constant dense<0.000000e+00> : vector<32x128xf32>
    %9 = vector.multi_reduction <add>, %8, %cst_9 [1] : vector<32x8x128xf32> to vector<32x128xf32>
    %10 = vector.shape_cast %9 : vector<32x128xf32> to vector<32x1x128xf32>
    %11 = vector.broadcast %10 : vector<32x1x128xf32> to vector<32x8x128xf32>
    %12 = arith.subf %11, %8 : vector<32x8x128xf32>
    %13 = arith.mulf %6, %12 : vector<32x8x128xf32>
    %cst_10 = arith.constant dense<0.000000e+00> : vector<32x8xf32>
    %14 = vector.multi_reduction <add>, %13, %cst_10 [2] : vector<32x8x128xf32> to vector<32x8xf32>
    %15 = vector.shape_cast %14 : vector<32x8xf32> to vector<32x8x1xf32>
    %16 = vector.broadcast %3 : f32 to vector<32x8x1xf32>
    %17 = arith.addf %15, %16 : vector<32x8x1xf32>
    %cst_11 = arith.constant 0.000000e+00 : f32
    %18 = vector.broadcast %cst_11 : f32 to vector<32x8x1xf32>
    %19 = arith.maximumf %17, %18 : vector<32x8x1xf32>
    %20 = arith.mulf %1, %19 : vector<32x8x1xf32>
    %c0_12 = arith.constant 0 : index
    %c0_13 = arith.constant 0 : index
    %c0_14 = arith.constant 0 : index
    %21 = vector.load %arg5[%c0_12, %c0_13, %c0_14] : memref<32x8x1xf32, #tpu.memory_space<vmem>>, vector<32x8x1xf32>
    tpu.vector_store %arg5[%c0_12, %c0_13, %c0_14], %20 {strides = array<i32>} : memref<32x8x1xf32, #tpu.memory_space<vmem>>, vector<32x8x1xf32>,
    return
  }
  func.func @transform_0(%arg0: i32) -> (i32, i32, i32) {
    %c0_i32 = arith.constant 0 : i32
    %c0_i32_0 = arith.constant 0 : i32
    %c0_i32_1 = arith.constant 0 : i32
    return %arg0, %c0_i32, %c0_i32_0 : i32, i32, i32
  }
  func.func @transform_1(%arg0: i32) -> (i32, i32, i32) {
    %c0_i32 = arith.constant 0 : i32
    %c0_i32_0 = arith.constant 0 : i32
    %c0_i32_1 = arith.constant 0 : i32
    return %arg0, %c0_i32, %c0_i32_0 : i32, i32, i32
  }
  func.func @transform_2(%arg0: i32) -> (i32, i32) {
    %c0_i32 = arith.constant 0 : i32
    %c0_i32_0 = arith.constant 0 : i32
    %c0_i32_1 = arith.constant 0 : i32
    return %c0_i32, %c0_i32_0 : i32, i32
  }
  func.func @transform_3(%arg0: i32) -> (i32, i32) {
    %c0_i32 = arith.constant 0 : i32
    %c0_i32_0 = arith.constant 0 : i32
    %c0_i32_1 = arith.constant 0 : i32
    return %c0_i32, %c0_i32_0 : i32, i32
  }
  func.func @transform_4(%arg0: i32) -> (i32, i32, i32) {
    %c0_i32 = arith.constant 0 : i32
    %c0_i32_0 = arith.constant 0 : i32
    %c0_i32_1 = arith.constant 0 : i32
    return %arg0, %c0_i32, %c0_i32_0 : i32, i32, i32
  }
}

</mosaic_0001>

<bundles_post_ra>
// kernel: tpu_custom_call.1
= control target key start
LH: loop header
LB: loop body
LE: loop exit
PB: predicated region body
PF: predicated region fallthrough
CT: control target
= control target key end

     0   :  { %10 = vsyncpa [#allocation4], 0  ;;  %s1200_s15 = smov [#allocation3]   ;;  %s2061_s0 = inlined_call_operand.vmem [shape: f32[32,8,128], index: 0, kind: input, shape index: {}]   ;;  %s2062_s1 = inlined_call_operand.vmem [shape: f32[32,8,1], index: 1, kind: input, shape index: {}]   ;;  %s2063_s2 = inlined_call_operand.hbm [shape: f32[128,128], index: 2, kind: input, shape index: {}]   ;;  %s2064_s3 = inlined_call_operand.<no memory space> [shape: f32[1,1], index: 3, kind: input, shape index: {}]   ;;  %s2065_s4 = inlined_call_operand.vmem [shape: f32[32,8,1], index: 4, kind: output, shape index: {}]  }
   0x1   :  { %s20_s16 = sshll.u32 %s1200_s15, 4  ;;  %s21_s16 = int_to_ptr.vmem [resolvable:$true] %s20_s16 }
   0x2   :  { %s1186_s17 = scalar_lea.vmem %s21_s16, 2048  ;;  %p1191_p1 = scmp.lt.s32.totalorder %s21_s16, %s21_s16 }
   0x3   :  { %p1187_p0 = scmp.ne.s32.totalorder %s21_s16, %s1186_s17  ;;  %p1192_p2 = scmp.lt.s32.totalorder %s1186_s17, %s1186_s17 }
   0x5   :  { %p1193_p3 = por %p1192_p2, %p1191_p1 }
   0x7   :  { %p1194_p4 = pnand %p1193_p3, %p1187_p0 }
   0x9   :  { %1197 = shalt.err (!%p1194_p4)
}
   0xa   :  { %s1201_s18 = smov 128   ;;  %s1202_s19 = smov 8  }
   0xb   :  { %26 = dma.hbm_to_vmem [thread:$0]  %s2063_s2, 2048, %s21_s16, [#allocation4], %s1201_s18, %s1201_s18, %s1202_s19  }
   0xc   :  { %1198 = dma.done.wait [#allocation4], 2048  }
   0xd   :  { %1199 = vsyncadd [#allocation4], 4294965248  ;;  %v1203_v0 = vmov 0   ;;  %v111_v1 = vld [vmem:[#allocation3 + $0x78] sm:$0xff]  ;;  %v66_v2 = vld [vmem:[%s2062_s1 + $0x10] sm:$0xff]  ;;  %vm947_vm0 = vcmask 7168  }
   0xe   :  { %1150 = vset.pattern.permute.xlu1 %v1203_v0  ;;  %1149 = vset.pattern.permute.xlu0 %v1203_v0  ;;  %v64_v3 = vld [vmem:[%s2062_s1] sm:$0xff]  ;;  %v110_v4 = vld [vmem:[#allocation3 + $0x70] sm:$0xff]  ;;  %v109_v5 = vld [vmem:[#allocation3 + $0x68] sm:$0xff] }
   0xf   :  { %1033 = vmatprep.subr.mxu0 %v111_v1  ;;  %1113 = vmatprep.subr.mxu1 %v111_v1  ;;  %v67_v6 = vld [vmem:[%s2062_s1 + $0x18] sm:$0xff]  ;;  %v65_v7 = vld [vmem:[%s2062_s1 + $0x8] sm:$0xff]  ;;  %v108_v8 = vld [vmem:[#allocation3 + $0x60] sm:$0xff] }
  0x10   :  { %350 = vperm.xlu1 %1150, %v66_v2   ;;  %340 = vperm.xlu0 %1149, %v64_v3   ;;  %v107_v9 = vld [vmem:[#allocation3 + $0x58] sm:$0xff]  ;;  %v69_v10 = vld [vmem:[%s2062_s1 + $0x28] sm:$0xff]  ;;  %v68_v11 = vld [vmem:[%s2062_s1 + $0x20] sm:$0xff] }
  0x11   :  { %1034 = vmatpush3.msra.mxu0 %v111_v1  ;;  %1129 = vmatpush3.msra.mxu1 %v111_v1  ;;  %v106_v12 = vld [vmem:[#allocation3 + $0x50] sm:$0xff]  ;;  %v105_v13 = vld [vmem:[#allocation3 + $0x48] sm:$0xff]  ;;  %v71_v14 = vld [vmem:[%s2062_s1 + $0x38] sm:$0xff] }
  0x12   :  { %1035 = vmatprep.subr.mxu0 %v110_v4  ;;  %1114 = vmatprep.subr.mxu1 %v110_v4  ;;  %v70_v15 = vld [vmem:[%s2062_s1 + $0x30] sm:$0xff]  ;;  %v104_v16 = vld [vmem:[#allocation3 + $0x40] sm:$0xff]  ;;  %v103_v17 = vld [vmem:[#allocation3 + $0x38] sm:$0xff] }
  0x13   :  { %1036 = vmatpush3.msra.mxu0 %v110_v4  ;;  %1130 = vmatpush3.msra.mxu1 %v110_v4  ;;  %v73_v18 = vld [vmem:[%s2062_s1 + $0x48] sm:$0xff]  ;;  %v72_v19 = vld [vmem:[%s2062_s1 + $0x40] sm:$0xff]  ;;  %v102_v20 = vld [vmem:[#allocation3 + $0x30] sm:$0xff] }
  0x14   :  { %1037 = vmatprep.subr.mxu0 %v109_v5  ;;  %1115 = vmatprep.subr.mxu1 %v109_v5  ;;  %v101_v21 = vld [vmem:[#allocation3 + $0x28] sm:$0xff]  ;;  %v75_v22 = vld [vmem:[%s2062_s1 + $0x58] sm:$0xff]  ;;  %v74_v23 = vld [vmem:[%s2062_s1 + $0x50] sm:$0xff] }
  0x15   :  { %355 = vperm.xlu1 %1150, %v67_v6   ;;  %345 = vperm.xlu0 %1149, %v65_v7   ;;  %v100_v24 = vld [vmem:[#allocation3 + $0x20] sm:$0xff]  ;;  %v99_v25 = vld [vmem:[#allocation3 + $0x18] sm:$0xff]  ;;  %v77_v26 = vld [vmem:[%s2062_s1 + $0x68] sm:$0xff] }
  0x16   :  { %1038 = vmatpush3.msra.mxu0 %v109_v5  ;;  %1131 = vmatpush3.msra.mxu1 %v109_v5  ;;  %v76_v27 = vld [vmem:[%s2062_s1 + $0x60] sm:$0xff]  ;;  %v98_v28 = vld [vmem:[#allocation3 + $0x10] sm:$0xff]  ;;  %v97_v29 = vld [vmem:[#allocation3 + $0x8] sm:$0xff] }
  0x17   :  { %1039 = vmatprep.subr.mxu0 %v108_v8  ;;  %1116 = vmatprep.subr.mxu1 %v108_v8  ;;  %v79_v30 = vld [vmem:[%s2062_s1 + $0x78] sm:$0xff]  ;;  %v78_v31 = vld [vmem:[%s2062_s1 + $0x70] sm:$0xff]  ;;  %v96_v32 = vld [vmem:[#allocation3] sm:$0xff] }
  0x18   :  { %1040 = vmatpush3.msra.mxu0 %v108_v8  ;;  %1132 = vmatpush3.msra.mxu1 %v108_v8  ;;  %v1283_v33 = vld [vmem:[%s2061_s0] sm:$0xff]  ;;  %v1293_v35 = vld [vmem:[%s2062_s1 + $0x88] sm:$0xff]  ;;  %v1315_v39 = vld [vmem:[%s2061_s0 + $0x10] sm:$0xff] }
  0x19   :  { %1041 = vmatprep.subr.mxu0 %v107_v9  ;;  %1117 = vmatprep.subr.mxu1 %v107_v9  ;;  %v1288_v34 = vld [vmem:[%s2061_s0 + $0x80] sm:$0xff]  ;;  %2077 = vst [vmem:[#allocation6_spill] sm:$0xff] %v1293_v35  ;;  %v1303_v37 = vld [vmem:[%s2061_s0 + $0x8] sm:$0xff]  ;;  %v1320_v40 = vld [vmem:[%s2061_s0 + $0x90] sm:$0xff] }
  0x1a   :  { %365 = vperm.xlu1 %1150, %v69_v10   ;;  %360 = vperm.xlu0 %1149, %v68_v11   ;;  %v1298_v36 = vld [vmem:[%s2062_s1 + $0x80] sm:$0xff]  ;;  %v1308_v38 = vld [vmem:[%s2061_s0 + $0x88] sm:$0xff]  ;;  %v1329_v41 = vld [vmem:[%s2062_s1 + $0x98] sm:$0xff] }
  0x1b   :  { %1042 = vmatpush3.msra.mxu0 %v107_v9  ;;  %1133 = vmatpush3.msra.mxu1 %v107_v9  ;;  %2078 = vst [vmem:[#allocation7_spill] sm:$0xff] %v1298_v36  ;;  %2079 = vst [vmem:[#allocation8_spill] sm:$0xff] %v1329_v41  ;;  %v1334_v42 = vld [vmem:[%s2062_s1 + $0x90] sm:$0xff]  ;;  %v1341_v43 = vld [vmem:[%s2061_s0 + $0x18] sm:$0xff] }
  0x1c   :  { %1043 = vmatprep.subr.mxu0 %v106_v12  ;;  %1118 = vmatprep.subr.mxu1 %v106_v12  ;;  %2080 = vst [vmem:[#allocation9_spill] sm:$0xff] %v1334_v42  ;;  %v1346_v44 = vld [vmem:[%s2061_s0 + $0x98] sm:$0xff]  ;;  %v1351_v45 = vld [vmem:[%s2061_s0 + $0x20] sm:$0xff]  ;;  %v85_v47 = vld [vmem:[%s2062_s1 + $0xa8] sm:$0xff] }
  0x1d   :  { %1044 = vmatpush3.msra.mxu0 %v106_v12  ;;  %1134 = vmatpush3.msra.mxu1 %v106_v12  ;;  %v1356_v46 = vld [vmem:[%s2061_s0 + $0xa0] sm:$0xff]  ;;  %v1375_v49 = vld [vmem:[%s2061_s0 + $0x28] sm:$0xff]  ;;  %v1385_v51 = vld [vmem:[%s2061_s0 + $0x30] sm:$0xff] }
  0x1e   :  { %1045 = vmatprep.subr.mxu0 %v105_v13  ;;  %1119 = vmatprep.subr.mxu1 %v105_v13  ;;  %v1368_v48 = vld [vmem:[%s2062_s1 + $0xa0] sm:$0xff]  ;;  %v1380_v50 = vld [vmem:[%s2061_s0 + $0xa8] sm:$0xff]  ;;  %v1390_v52 = vld [vmem:[%s2061_s0 + $0xb0] sm:$0xff] }
  0x1f   :  { %375 = vperm.xlu1 %1150, %v71_v14   ;;  %370 = vperm.xlu0 %1149, %v70_v15   ;;  %2081 = vst [vmem:[#allocation10_spill] sm:$0xff] %v1368_v48  ;;  %v87_v53 = vld [vmem:[%s2062_s1 + $0xb8] sm:$0xff]  ;;  %v86_v54 = vld [vmem:[%s2062_s1 + $0xb0] sm:$0xff]  ;;  %v1416_v57 = vld [vmem:[%s2061_s0 + $0x40] sm:$0xff] }
  0x20   :  { %1046 = vmatpush3.msra.mxu0 %v105_v13  ;;  %1135 = vmatpush3.msra.mxu1 %v105_v13  ;;  %v1406_v55 = vld [vmem:[%s2061_s0 + $0x38] sm:$0xff]  ;;  %v1421_v58 = vld [vmem:[%s2061_s0 + $0xc0] sm:$0xff]  ;;  %v89_v59 = vld [vmem:[%s2062_s1 + $0xc8] sm:$0xff] }
  0x21   :  { %1047 = vmatprep.subr.mxu0 %v104_v16  ;;  %1120 = vmatprep.subr.mxu1 %v104_v16  ;;  %v1411_v56 = vld [vmem:[%s2061_s0 + $0xb8] sm:$0xff]  ;;  %v88_v60 = vld [vmem:[%s2062_s1 + $0xc0] sm:$0xff]  ;;  %v1436_v61 = vld [vmem:[%s2061_s0 + $0x48] sm:$0xff] }
  0x22   :  { %1048 = vmatpush3.msra.mxu0 %v104_v16  ;;  %1136 = vmatpush3.msra.mxu1 %v104_v16  ;;  %v1441_v62 = vld [vmem:[%s2061_s0 + $0xc8] sm:$0xff]  ;;  %v1446_v63 = vld [vmem:[%s2061_s0 + $0x50] sm:$0xff]  ;;  %v91_v1 = vld [vmem:[%s2062_s1 + $0xd8] sm:$0xff] }
  0x23   :  { %1049 = vmatprep.subr.mxu0 %v103_v17  ;;  %1121 = vmatprep.subr.mxu1 %v103_v17  ;;  %v1451_v0 = vld [vmem:[%s2061_s0 + $0xd0] sm:$0xff]  ;;  %v1466_v3 = vld [vmem:[%s2061_s0 + $0x58] sm:$0xff]  ;;  %v1476_v5 = vld [vmem:[%s2061_s0 + $0x60] sm:$0xff] }
  0x24   :  { %385 = vperm.xlu1 %1150, %v73_v18   ;;  %380 = vperm.xlu0 %1149, %v72_v19   ;;  %v90_v2 = vld [vmem:[%s2062_s1 + $0xd0] sm:$0xff]  ;;  %v1471_v4 = vld [vmem:[%s2061_s0 + $0xd8] sm:$0xff]  ;;  %v1481_v6 = vld [vmem:[%s2061_s0 + $0xe0] sm:$0xff] }
  0x25   :  { %1050 = vmatpush3.msra.mxu0 %v103_v17  ;;  %1137 = vmatpush3.msra.mxu1 %v103_v17  ;;  %2082 = vst [vmem:[#allocation11_spill] sm:$0xff] %v1481_v6  ;;  %v93_v7 = vld [vmem:[%s2062_s1 + $0xe8] sm:$0xff]  ;;  %v92_v8 = vld [vmem:[%s2062_s1 + $0xe0] sm:$0xff]  ;;  %v1506_v11 = vld [vmem:[%s2061_s0 + $0x70] sm:$0xff] }
  0x26   :  { %1051 = vmatprep.subr.mxu0 %v102_v20  ;;  %1122 = vmatprep.subr.mxu1 %v102_v20  ;;  %v1496_v9 = vld [vmem:[%s2061_s0 + $0x68] sm:$0xff]  ;;  %2084 = vst [vmem:[#allocation13_spill] sm:$0xff] %v1506_v11  ;;  %v1511_v12 = vld [vmem:[%s2061_s0 + $0xf0] sm:$0xff]  ;;  %v95_v13 = vld [vmem:[%s2062_s1 + $0xf8] sm:$0xff] }
  0x27   :  { %1052 = vmatpush3.msra.mxu0 %v102_v20  ;;  %1138 = vmatpush3.msra.mxu1 %v102_v20  ;;  %v1501_v10 = vld [vmem:[%s2061_s0 + $0xe8] sm:$0xff]  ;;  %2085 = vst [vmem:[#allocation14_spill] sm:$0xff] %v1511_v12  ;;  %v94_v14 = vld [vmem:[%s2062_s1 + $0xf0] sm:$0xff]  ;;  %v1526_v15 = vld [vmem:[%s2061_s0 + $0x78] sm:$0xff] }
  0x28   :  { %1053 = vmatprep.subr.mxu0 %v101_v21  ;;  %1123 = vmatprep.subr.mxu1 %v101_v21  ;;  %2083 = vst [vmem:[#allocation12_spill] sm:$0xff] %v1501_v10  ;;  %2086 = vst [vmem:[#allocation15_spill] sm:$0xff] %v1526_v15  ;;  %v1531_v16 = vld [vmem:[%s2061_s0 + $0xf8] sm:$0xff] }
  0x29   :  { %395 = vperm.xlu1 %1150, %v75_v22   ;;  %390 = vperm.xlu0 %1149, %v74_v23   ;;  %2087 = vst [vmem:[#allocation16_spill] sm:$0xff] %v1531_v16 }
  0x2a   :  { %1054 = vmatpush3.msra.mxu0 %v101_v21  ;;  %1139 = vmatpush3.msra.mxu1 %v101_v21 }
  0x2b   :  { %1055 = vmatprep.subr.mxu0 %v100_v24  ;;  %1124 = vmatprep.subr.mxu1 %v100_v24 }
  0x2c   :  { %1056 = vmatpush3.msra.mxu0 %v100_v24  ;;  %1140 = vmatpush3.msra.mxu1 %v100_v24 }
  0x2d   :  { %1057 = vmatprep.subr.mxu0 %v99_v25  ;;  %1125 = vmatprep.subr.mxu1 %v99_v25 }
  0x2e   :  { %405 = vperm.xlu1 %1150, %v77_v26   ;;  %400 = vperm.xlu0 %1149, %v76_v27  }
  0x2f   :  { %1058 = vmatpush3.msra.mxu0 %v99_v25  ;;  %1141 = vmatpush3.msra.mxu1 %v99_v25 }
  0x30   :  { %1059 = vmatprep.subr.mxu0 %v98_v28  ;;  %1126 = vmatprep.subr.mxu1 %v98_v28 }
  0x31   :  { %1060 = vmatpush3.msra.mxu0 %v98_v28  ;;  %1142 = vmatpush3.msra.mxu1 %v98_v28 }
  0x32   :  { %1061 = vmatprep.subr.mxu0 %v97_v29  ;;  %1127 = vmatprep.subr.mxu1 %v97_v29 }
  0x33   :  { %415 = vperm.xlu1 %1150, %v79_v30   ;;  %410 = vperm.xlu0 %1149, %v78_v31  }
  0x34   :  { %1062 = vmatpush3.msra.mxu0 %v97_v29  ;;  %1143 = vmatpush3.msra.mxu1 %v97_v29 }
  0x35   :  { %1063 = vmatprep.subr.mxu0 %v96_v32  ;;  %1128 = vmatprep.subr.mxu1 %v96_v32 }
  0x36   :  { %1064 = vmatpush3.msra.mxu0 %v96_v32  ;;  %1144 = vmatpush3.msra.mxu1 %v96_v32 }
  0x37   :  { %1065 = vmatprep.mubr.f32.mxu0 %v1283_v33  ;;  %1089 = vmatprep.mubr.f32.mxu1 %v1288_v34 }
  0x38   :  { %425 = vperm.xlu1 %1150, %v1293_v35   ;;  %420 = vperm.xlu0 %1149, %v1298_v36  }
  0x39   :  { %1066 = vmatmul.mubr.f32.vlgmr.msra.gmra.mxu0 %v1303_v37  ;;  %1090 = vmatmul.mubr.f32.vlgmr.msra.gmra.mxu1 %v1308_v38 }
  0x3a   :  { %1068 = vmatprep.mubr.f32.mxu0 %v1315_v39  ;;  %1092 = vmatprep.mubr.f32.mxu1 %v1320_v40 }
  0x3c   :  { %435 = vperm.xlu1 %1150, %v1329_v41   ;;  %430 = vperm.xlu0 %1149, %v1334_v42  }
  0x3d   :  { %1069 = vmatmul.mubr.f32.gmra.mxu0 %v1341_v43  ;;  %1093 = vmatmul.mubr.f32.gmra.mxu1 %v1346_v44 }
  0x3e   :  { %1071 = vmatprep.mubr.f32.mxu0 %v1351_v45  ;;  %1095 = vmatprep.mubr.f32.mxu1 %v1356_v46 }
  0x40   :  { %445 = vperm.xlu1 %1150, %v85_v47   ;;  %440 = vperm.xlu0 %1149, %v1368_v48  }
  0x41   :  { %1072 = vmatmul.mubr.f32.gmra.mxu0 %v1375_v49  ;;  %1096 = vmatmul.mubr.f32.gmra.mxu1 %v1380_v50 }
  0x42   :  { %1074 = vmatprep.mubr.f32.mxu0 %v1385_v51  ;;  %1098 = vmatprep.mubr.f32.mxu1 %v1390_v52 }
  0x44   :  { %455 = vperm.xlu1 %1150, %v87_v53   ;;  %450 = vperm.xlu0 %1149, %v86_v54  }
  0x45   :  { %1075 = vmatmul.mubr.f32.gmra.mxu0 %v1406_v55  ;;  %1099 = vmatmul.mubr.f32.gmra.mxu1 %v1411_v56 }
  0x46   :  { %1077 = vmatprep.mubr.f32.mxu0 %v1416_v57  ;;  %1101 = vmatprep.mubr.f32.mxu1 %v1421_v58 }
  0x48   :  { %465 = vperm.xlu1 %1150, %v89_v59   ;;  %460 = vperm.xlu0 %1149, %v88_v60  }
  0x49   :  { %1078 = vmatmul.mubr.f32.gmra.mxu0 %v1436_v61  ;;  %1102 = vmatmul.mubr.f32.gmra.mxu1 %v1441_v62 }
  0x4a   :  { %1080 = vmatprep.mubr.f32.mxu0 %v1446_v63  ;;  %1104 = vmatprep.mubr.f32.mxu1 %v1451_v0 }
  0x4c   :  { %475 = vperm.xlu1 %1150, %v91_v1   ;;  %470 = vperm.xlu0 %1149, %v90_v2  }
  0x4d   :  { %1081 = vmatmul.mubr.f32.gmra.mxu0 %v1466_v3  ;;  %1105 = vmatmul.mubr.f32.gmra.mxu1 %v1471_v4 }
  0x4e   :  { %1083 = vmatprep.mubr.f32.mxu0 %v1476_v5  ;;  %1107 = vmatprep.mubr.f32.mxu1 %v1481_v6 }
  0x50   :  { %485 = vperm.xlu1 %1150, %v93_v7   ;;  %480 = vperm.xlu0 %1149, %v92_v8  }
  0x51   :  { %1084 = vmatmul.mubr.f32.gmra.mxu0 %v1496_v9  ;;  %1108 = vmatmul.mubr.f32.gmra.mxu1 %v1501_v10 }
  0x52   :  { %1086 = vmatprep.mubr.f32.mxu0 %v1506_v11  ;;  %1110 = vmatprep.mubr.f32.mxu1 %v1511_v12 }
  0x54   :  { %495 = vperm.xlu1 %1150, %v95_v13   ;;  %490 = vperm.xlu0 %1149, %v94_v14  }
  0x55   :  { %1087 = vmatmul.mubr.f32.gmra.mxu0 %v1526_v15  ;;  %1111 = vmatmul.mubr.f32.gmra.mxu1 %v1531_v16 }
  0x8b   :  { %v351_v17 = vpop.permute.xlu1 %350  ;;  %v341_v18 = vpop.permute.xlu0 %340 }
  0x8c   :  { %v1550_v32 = vmul.f32 %v341_v18, %v1283_v33  ;;  %v1555_v53 = vmul.f32 %v351_v17, %v1315_v39 }
  0x8e   :  { %v530_v54 = vrot.slane %v1550_v32, 4  ;;  %v542_v2 = vrot.slane %v1555_v53, 4 }
  0x90   :  { %v356_v19 = vpop.permute.xlu1 %355  ;;  %v346_v20 = vpop.permute.xlu0 %345  ;;  %v531_v8 = vadd.f32 %v530_v54, %v1550_v32 }
  0x91   :  { %v1559_v59 = vmul.f32 %v356_v19, %v1341_v43  ;;  %v1562_v60 = vmul.f32 %v346_v20, %v1303_v37  ;;  %v543_v37 = vadd.f32 %v542_v2, %v1555_v53 }
  0x92   :  { %v532_v18 = vrot.slane %v531_v8, 2 }
  0x93   :  { %v548_v39 = vrot.slane %v1559_v59, 4  ;;  %v536_v13 = vrot.slane %v1562_v60, 4 }
  0x94   :  { %v533_v41 = vadd.f32 %v532_v18, %v531_v8 }
  0x95   :  { %v366_v21 = vpop.permute.xlu1 %365  ;;  %v361_v22 = vpop.permute.xlu0 %360  ;;  %v549_v19 = vadd.f32 %v548_v39, %v1559_v59  ;;  %v537_v20 = vadd.f32 %v536_v13, %v1562_v60 }
  0x96   :  { %v1572_v14 = vmul.f32 %v366_v21, %v1375_v49  ;;  %v534_v18 = vrot.slane %v533_v41, 1 }
  0x98   :  { %v560_v54 = vrot.slane %v1572_v14, 4 }
  0x9a   :  { %v376_v23 = vpop.permute.xlu1 %375  ;;  %v371_v24 = vpop.permute.xlu0 %370  ;;  %v561_v39 = vadd.f32 %v560_v54, %v1572_v14 }
  0x9b   :  { %v1602_v16 = vmul.f32 %v371_v24, %v1385_v51 }
  0x9d   :  { %v566_v51 = vrot.slane %v1602_v16, 4 }
  0x9f   :  { %v1535_v25 = vpop.permute.xlu1 %385  ;;  %v1537_v26 = vpop.permute.xlu0 %380 }
  0xa4   :  { %v1539_v27 = vpop.permute.xlu1 %395  ;;  %v1541_v28 = vpop.permute.xlu0 %390 }
  0xa9   :  { %v1543_v29 = vpop.permute.xlu1 %405  ;;  %v1545_v30 = vpop.permute.xlu0 %400 }
  0xae   :  { %v1547_v31 = vpop.permute.xlu1 %415  ;;  %v1552_v47 = vpop.permute.xlu0 %410 }
  0xaf   :  { %2088 = vst [vmem:[#allocation17_spill] sm:$0xff] %v1547_v31  ;;  %2089 = vst [vmem:[#allocation18_spill] sm:$0xff] %v1552_v47  ;;  %v562_v31 = vrot.slane %v561_v39, 2  ;;  %v567_v47 = vadd.f32 %v566_v51, %v1602_v16 }
  0xb1   :  { %v563_v12 = vadd.f32 %v562_v31, %v561_v39 }
  0xb3   :  { %v426_v1 = vpop.permute.xlu1 %425  ;;  %v421_v33 = vpop.permute.xlu0 %420  ;;  %v564_v51 = vrot.slane %v563_v12, 1 }
  0xb4   :  { %v1566_v7 = vmul.f32 %v426_v1, %v1308_v38  ;;  %v1575_v43 = vmul.f32 %v421_v33, %v1288_v34  ;;  %v1580_v38 = vmul.f32 %v361_v22, %v1351_v45  ;;  %v544_v1 = vrot.slane %v543_v37, 2 }
  0xb5   :  { %v550_v45 = vrot.slane %v549_v19, 2  ;;  %v538_v22 = vrot.slane %v537_v20, 2 }
  0xb6   :  { %v632_v17 = vrot.slane %v1566_v7, 4  ;;  %v626_v49 = vrot.slane %v1575_v43, 4  ;;  %v554_v33 = vrot.slane %v1580_v38, 4 }
  0xb7   :  { %v431_v21 = vpop.permute.xlu0 %430  ;;  %v436_v48 = vpop.permute.xlu1 %435  ;;  %v539_v8 = vadd.f32 %v538_v22, %v537_v20  ;;  %v551_v54 = vadd.f32 %v550_v45, %v549_v19  ;;  %v1611_v20 = vadd.f32 %v534_v18, %v533_v41  ;;  %v1621_v41 = vmul.f32 %v1535_v25, %v1436_v61 }
  0xb8   :  { %v633_v34 = vadd.f32 %v632_v17, %v1566_v7  ;;  %v1588_v2 = vmul.f32 %v431_v21, %v1320_v40  ;;  %v627_v13 = vadd.f32 %v626_v49, %v1575_v43  ;;  %v1594_v42 = vmul.f32 %v436_v48, %v1346_v44 }
  0xb9   :  { %v545_v17 = vadd.f32 %v544_v1, %v543_v37  ;;  %v555_v40 = vadd.f32 %v554_v33, %v1580_v38  ;;  %v1599_v21 = vmul.f32 %v376_v23, %v1406_v55  ;;  %v540_v24 = vrot.slane %v539_v8, 1 }
  0xba   :  { %v634_v36 = vrot.slane %v633_v34, 2  ;;  %v638_v35 = vrot.slane %v1588_v2, 4  ;;  %v628_v49 = vrot.slane %v627_v13, 2  ;;  %v644_v44 = vrot.slane %v1594_v42, 4 }
  0xbb   :  { %v441_v48 = vpop.permute.xlu0 %440  ;;  %v546_v33 = vrot.slane %v545_v17, 1  ;;  %v556_v55 = vrot.slane %v555_v40, 2  ;;  %v572_v23 = vrot.slane %v1599_v21, 4  ;;  %v552_v19 = vrot.slane %v551_v54, 1 }
  0xbc   :  { %v639_v15 = vadd.f32 %v638_v35, %v1588_v2  ;;  %v1607_v37 = vmul.f32 %v441_v48, %v1356_v46  ;;  %v635_v1 = vadd.f32 %v634_v36, %v633_v34  ;;  %v645_v45 = vadd.f32 %v644_v44, %v1594_v42  ;;  %v446_v35 = vpop.permute.xlu1 %445 }
  0xbd   :  { %v629_v22 = vadd.f32 %v628_v49, %v627_v13  ;;  %v1615_v36 = vadd.f32 %v546_v33, %v545_v17  ;;  %v573_v34 = vadd.f32 %v572_v23, %v1599_v21  ;;  %v557_v18 = vadd.f32 %v556_v55, %v555_v40 }
  0xbe   :  { %v640_v10 = vrot.slane %v639_v15, 2  ;;  %v650_v46 = vrot.slane %v1607_v37, 4  ;;  %v636_v48 = vrot.slane %v635_v1, 1  ;;  %v1625_v13 = vmul.f32 %v1537_v26, %v1416_v57 }
  0xbf   :  { %v541_v31 = vadd.f32 %v540_v24, %v539_v8  ;;  %v722_v39 = vsub.f32 %v1611_v20, %v1550_v32  ;;  %v1629_v49 = vadd.f32 %v552_v19, %v551_v54  ;;  %v646_v17 = vrot.slane %v645_v45, 2  ;;  %v451_v33 = vpop.permute.xlu0 %450 }
  0xc0   :  { %v1632_v44 = vmul.f32 %v446_v35, %v1380_v50  ;;  %v630_v23 = vrot.slane %v629_v22, 1  ;;  %v651_v61 = vadd.f32 %v650_v46, %v1607_v37  ;;  %v1636_v25 = vmul.f32 %v451_v33, %v1390_v52  ;;  %v456_v19 = vpop.permute.xlu1 %455 }
  0xc1   :  { %v637_v57 = vadd.f32 %v636_v48, %v635_v1  ;;  %v641_v26 = vadd.f32 %v640_v10, %v639_v15  ;;  %v574_v40 = vrot.slane %v573_v34, 2  ;;  %v568_v8 = vrot.slane %v567_v47, 2 }
  0xc2   :  { %v584_v32 = vrot.slane %v1621_v41, 4  ;;  %v558_v54 = vrot.slane %v557_v18, 1  ;;  %v578_v55 = vrot.slane %v1625_v13, 4  ;;  %v723_v50 = vsub.f32 %v541_v31, %v1562_v60 }
  0xc3   :  { %v656_v52 = vrot.slane %v1632_v44, 4  ;;  %v631_v1 = vadd.f32 %v630_v23, %v629_v22  ;;  %v647_v10 = vadd.f32 %v646_v17, %v645_v45  ;;  %v1646_v15 = vadd.f32 %v564_v51, %v563_v12  ;;  %v461_v45 = vpop.permute.xlu0 %460 }
  0xc4   :  { %v652_v35 = vrot.slane %v651_v61, 2  ;;  %v662_v46 = vrot.slane %v1636_v25, 4  ;;  %v739_v48 = vsub.f32 %v637_v57, %v1566_v7  ;;  %v642_v33 = vrot.slane %v641_v26, 1 }
  0xc5   :  { %v1651_v60 = vadd.f32 %v584_v32, %v1621_v41  ;;  %v1653_v11 = vadd.f32 %v558_v54, %v557_v18  ;;  %v575_v20 = vadd.f32 %v574_v40, %v573_v34  ;;  %v569_v6 = vadd.f32 %v568_v8, %v567_v47 }
  0xc6   :  { %v1656_v22 = vadd.f32 %v578_v55, %v1625_v13  ;;  %v1659_v12 = vmul.f32 %v456_v19, %v1411_v56  ;;  %v657_v7 = vadd.f32 %v656_v52, %v1632_v44  ;;  %v1663_v51 = vmul.f32 %v461_v45, %v1421_v58 }
  0xc7   :  { %v738_v18 = vsub.f32 %v631_v1, %v1575_v43  ;;  %v648_v34 = vrot.slane %v647_v10, 1  ;;  %v663_v47 = vadd.f32 %v662_v46, %v1636_v25  ;;  %v643_v40 = vadd.f32 %v642_v33, %v641_v26 }
  0xc8   :  { %v653_v56 = vadd.f32 %v652_v35, %v651_v61  ;;  %v1669_v8 = vmul.f32 %v1539_v27, %v1466_v3  ;;  %v1673_v54 = vmul.f32 %v1541_v28, %v1446_v63  ;;  %v570_v26 = vrot.slane %v569_v6, 1 }
  0xc9   :  { %v658_v61 = vrot.slane %v657_v7, 2  ;;  %v674_v1 = vrot.slane %v1663_v51, 4  ;;  %v649_v3 = vadd.f32 %v648_v34, %v647_v10  ;;  %v726_v63 = vsub.f32 %v1653_v11, %v1580_v38 }
  0xca   :  { %v586_v28 = vrot.slane %v1651_v60, 2  ;;  %v664_v46 = vrot.slane %v663_v47, 2  ;;  %v740_v33 = vsub.f32 %v643_v40, %v1588_v2  ;;  %v596_v45 = vrot.slane %v1669_v8, 4 }
  0xcb   :  { %v590_v10 = vrot.slane %v1673_v54, 4  ;;  %v2090_v38 = vsub.f32 %v1629_v49, %v1559_v59  ;;  %v675_v40 = vadd.f32 %v674_v1, %v1663_v51  ;;  %v659_v43 = vadd.f32 %v658_v61, %v657_v7 }
  0xcc   :  { %v665_v59 = vadd.f32 %v664_v46, %v663_v47  ;;  %v587_v49 = vadd.f32 %v586_v28, %v1651_v60  ;;  %v597_v7 = vadd.f32 %v596_v45, %v1669_v8  ;;  %v1722_v46 = vmul.f32 %v1543_v29, %v1496_v9 }
  0xcd   :  { %v660_v1 = vrot.slane %v659_v43, 1 }
  0xf9   :  { %v1067_v31 = vpop.f32.mrf.mxu0  ;;  %v1091_v24 = vpop.f32.mrf.mxu1 }
  0xfa   :  { %v755_v17 = vmul.f32 %v1067_v31, %v723_v50  ;;  %v771_v23 = vmul.f32 %v1091_v24, %v739_v48  ;;  %v576_v50 = vrot.slane %v575_v20, 1  ;;  %v668_v24 = vrot.slane %v1659_v12, 4  ;;  %v466_v48 = vpop.permute.xlu1 %465 }
  0xfb   :  { %v179_v57 = vpop.f32.mrf.mxu0  ;;  %v259_v32 = vpop.f32.mrf.mxu1  ;;  %v580_v31 = vrot.slane %v1656_v22, 2  ;;  %v1695_v34 = vmul.f32 %v466_v48, %v1441_v62  ;;  %v1707_v62 = vmul.f32 %v1545_v30, %v1476_v5  ;;  %v676_v30 = vrot.slane %v675_v40, 2 }
  0xfc   :  { %820 = vadd.xlane.f32.xlu0 %v771_v23  ;;  %788 = vadd.xlane.f32.xlu1 %v755_v17  ;;  %v754_v52 = vmul.f32 %v722_v39, %v179_v57  ;;  %v770_v19 = vmul.f32 %v738_v18, %v259_v32  ;;  %v654_v39 = vrot.slane %v653_v56, 1  ;;  %v471_v17 = vpop.permute.xlu0 %470  ;;  %v1688_v57 = vadd.f32 %v576_v50, %v575_v20 }
  0xfd   :  { %v1070_v58 = vpop.f32.mrf.mxu0  ;;  %v1094_v55 = vpop.f32.mrf.mxu1  ;;  %v669_v11 = vadd.f32 %v668_v24, %v1659_v12  ;;  %v571_v18 = vadd.f32 %v570_v26, %v569_v6  ;;  %v1702_v50 = vmul.f32 %v471_v17, %v1451_v0  ;;  %v591_v6 = vadd.f32 %v590_v10, %v1673_v54  ;;  %v2092_v17 = vld [vmem:[#allocation11_spill] sm:$0xff] }
  0xfe   :  { %v757_v2 = vmul.f32 %v1070_v58, %v2090_v38  ;;  %v655_v24 = vadd.f32 %v654_v39, %v653_v56  ;;  %v476_v58 = vpop.permute.xlu1 %475  ;;  %v729_v56 = vsub.f32 %v1688_v57, %v1599_v21  ;;  %v680_v47 = vrot.slane %v1695_v34, 4 }
  0xff   :  { %v189_v27 = vpop.f32.mrf.mxu0  ;;  %v269_v35 = vpop.f32.mrf.mxu1  ;;  %v670_v61 = vrot.slane %v669_v11, 2  ;;  %v728_v5 = vsub.f32 %v571_v18, %v1602_v16  ;;  %v686_v60 = vrot.slane %v1702_v50, 4  ;;  %v602_v48 = vrot.slane %v1707_v62, 4 }
 0x100   :  { %818 = vadd.xlane.f32.xlu1 %v770_v19  ;;  %786 = vadd.xlane.f32.xlu0 %v754_v52  ;;  %v772_v32 = vmul.f32 %v740_v33, %v269_v35  ;;  %v741_v52 = vsub.f32 %v649_v3, %v1594_v42  ;;  %v581_v42 = vadd.f32 %v580_v31, %v1656_v22  ;;  %v481_v22 = vpop.permute.xlu0 %480  ;;  %v598_v18 = vrot.slane %v597_v7, 2 }
 0x101   :  { %v1686_v23 = vpop.f32.mrf.mxu0  ;;  %v1699_v19 = vpop.f32.mrf.mxu1  ;;  %v742_v28 = vsub.f32 %v655_v24, %v1607_v37  ;;  %v1726_v39 = vmul.f32 %v476_v58, %v1471_v4  ;;  %v2091_v16 = vsub.f32 %v1615_v36, %v1555_v53  ;;  %v588_v37 = vrot.slane %v587_v49, 1  ;;  %v2093_v58 = vld [vmem:[#allocation13_spill] sm:$0xff] }
 0x102   :  { %v773_v26 = vmul.f32 %v1094_v55, %v741_v52  ;;  %v666_v55 = vrot.slane %v665_v59, 1  ;;  %v582_v33 = vrot.slane %v581_v42, 1  ;;  %v681_v10 = vadd.f32 %v680_v47, %v1695_v34 }
 0x103   :  { %v199_v20 = vpop.f32.mrf.mxu0  ;;  %v279_v3 = vpop.f32.mrf.mxu1  ;;  %v756_v31 = vmul.f32 %v2091_v16, %v189_v27  ;;  %v1733_v38 = vmul.f32 %v481_v22, %v2092_v17  ;;  %v671_v29 = vadd.f32 %v670_v61, %v669_v11  ;;  %v687_v4 = vadd.f32 %v686_v60, %v1702_v50 }
 0x104   :  { %822 = vadd.xlane.f32.xlu1 %v772_v32  ;;  %792 = vadd.xlane.f32.xlu0 %v757_v2  ;;  %v758_v0 = vmul.f32 %v726_v63, %v199_v20  ;;  %v592_v63 = vrot.slane %v591_v6, 2  ;;  %v774_v45 = vmul.f32 %v742_v28, %v279_v3  ;;  %v661_v2 = vadd.f32 %v660_v1, %v659_v43  ;;  %v486_v60 = vpop.permute.xlu1 %485 }
 0x105   :  { %v1715_v35 = vpop.f32.mrf.mxu0  ;;  %v1735_v9 = vpop.f32.mrf.mxu1  ;;  %v667_v52 = vadd.f32 %v666_v55, %v665_v59  ;;  %v677_v20 = vadd.f32 %v676_v30, %v675_v40  ;;  %v608_v53 = vrot.slane %v1722_v46, 4  ;;  %v603_v36 = vadd.f32 %v602_v48, %v1707_v62 }
 0x106   :  { %v583_v27 = vadd.f32 %v582_v33, %v581_v42  ;;  %v593_v24 = vadd.f32 %v592_v63, %v591_v6  ;;  %v692_v11 = vrot.slane %v1726_v39, 4  ;;  %v682_v61 = vrot.slane %v681_v10, 2 }
 0x107   :  { %v209_v32 = vpop.f32.mrf.mxu0  ;;  %v698_v47 = vrot.slane %v1733_v38, 4  ;;  %v672_v1 = vrot.slane %v671_v29, 1  ;;  %v289_v3 = vpop.f32.mrf.mxu1  ;;  %v1752_v6 = vadd.f32 %v588_v37, %v587_v49  ;;  %v688_v42 = vrot.slane %v687_v4, 2 }
 0x108   :  { %824 = vadd.xlane.f32.xlu0 %v773_v26  ;;  %794 = vadd.xlane.f32.xlu1 %v758_v0  ;;  %v2094_v26 = vld [vmem:[#allocation18_spill] sm:$0xff]  ;;  %v2095_v0 = vsub.f32 %v1646_v15, %v1572_v14  ;;  %v760_v40 = vmul.f32 %v728_v5, %v209_v32  ;;  %v743_v22 = vsub.f32 %v661_v2, %v1632_v44  ;;  %v678_v55 = vrot.slane %v677_v20, 1  ;;  %v491_v15 = vpop.permute.xlu0 %490 }
 0x109   :  { %v1742_v43 = vmul.f32 %v2094_v26, %v2093_v58  ;;  %v1750_v30 = vpop.f32.mrf.mxu0  ;;  %v744_v28 = vsub.f32 %v667_v52, %v1636_v25  ;;  %v604_v14 = vrot.slane %v603_v36, 2  ;;  %v599_v5 = vadd.f32 %v598_v18, %v597_v7  ;;  %v1764_v37 = vpop.f32.mrf.mxu1  ;;  %v2098_v52 = vld [vmem:[#allocation15_spill] sm:$0xff] }
 0x10a   :  { %v759_v59 = vmul.f32 %v1686_v23, %v2095_v0  ;;  %v730_v23 = vsub.f32 %v583_v27, %v1625_v13  ;;  %v594_v63 = vrot.slane %v593_v24, 1  ;;  %v693_v49 = vadd.f32 %v692_v11, %v1726_v39  ;;  %v2097_v13 = vld [vmem:[#allocation14_spill] sm:$0xff]  ;;  %v2099_v27 = vld [vmem:[#allocation17_spill] sm:$0xff] }
 0x10b   :  { %v614_v48 = vrot.slane %v1742_v43, 4  ;;  %v775_v33 = vmul.f32 %v1699_v19, %v743_v22  ;;  %v776_v16 = vmul.f32 %v744_v28, %v289_v3  ;;  %v699_v25 = vadd.f32 %v698_v47, %v1733_v38  ;;  %v219_v2 = vpop.f32.mrf.mxu0  ;;  %v2100_v28 = vld [vmem:[#allocation16_spill] sm:$0xff] }
 0x10c   :  { %790 = vadd.xlane.f32.xlu0 %v756_v31  ;;  %826 = vadd.xlane.f32.xlu1 %v774_v45  ;;  %v2096_v31 = vld [vmem:[#allocation12_spill] sm:$0xff]  ;;  %v673_v45 = vadd.f32 %v672_v1, %v671_v29  ;;  %v683_v17 = vadd.f32 %v682_v61, %v681_v10  ;;  %v1767_v7 = vmul.f32 %v491_v15, %v2097_v13  ;;  %v694_v0 = vrot.slane %v693_v49, 2  ;;  %v299_v61 = vpop.f32.mrf.mxu1 }
 0x10d   :  { %v1761_v44 = vmul.f32 %v486_v60, %v2096_v31  ;;  %v679_v32 = vadd.f32 %v678_v55, %v677_v20  ;;  %v689_v18 = vadd.f32 %v688_v42, %v687_v4  ;;  %v609_v19 = vadd.f32 %v608_v53, %v1722_v46  ;;  %v1082_v47 = vpop.f32.mrf.mxu0 }
 0x10e   :  { %v1772_v58 = vmul.f32 %v2099_v27, %v2098_v52  ;;  %v731_v29 = vsub.f32 %v1752_v6, %v1621_v41  ;;  %v595_v26 = vadd.f32 %v594_v63, %v593_v24  ;;  %v615_v10 = vadd.f32 %v614_v48, %v1742_v43  ;;  %v496_v41 = vpop.permute.xlu1 %495 }
 0x10f   :  { %v761_v20 = vmul.f32 %v1715_v35, %v729_v56  ;;  %v762_v4 = vmul.f32 %v730_v23, %v219_v2  ;;  %v605_v11 = vadd.f32 %v604_v14, %v603_v36  ;;  %v704_v53 = vrot.slane %v1761_v44, 4  ;;  %v1106_v14 = vpop.f32.mrf.mxu1  ;;  %v229_v23 = vpop.f32.mrf.mxu0 }
 0x110   :  { %796 = vadd.xlane.f32.xlu0 %v759_v59  ;;  %798 = vadd.xlane.f32.xlu1 %v760_v40  ;;  %v745_v59 = vsub.f32 %v673_v45, %v1659_v12  ;;  %v684_v40 = vrot.slane %v683_v17, 1  ;;  %v700_v1 = vrot.slane %v699_v25, 2  ;;  %v710_v24 = vrot.slane %v1767_v7, 4 }
 0x111   :  { %v746_v3 = vsub.f32 %v679_v32, %v1663_v51  ;;  %v690_v6 = vrot.slane %v689_v18, 1  ;;  %v610_v21 = vrot.slane %v609_v19, 2  ;;  %v620_v57 = vrot.slane %v1772_v58, 4  ;;  %v309_v32 = vpop.f32.mrf.mxu1  ;;  %v1085_v52 = vpop.f32.mrf.mxu0 }
 0x112   :  { %v600_v56 = vrot.slane %v599_v5, 1  ;;  %v732_v35 = vsub.f32 %v595_v26, %v1673_v54  ;;  %v616_v36 = vrot.slane %v615_v10, 2  ;;  %v777_v12 = vmul.f32 %v1735_v9, %v745_v59 }
 0x113   :  { %v778_v42 = vmul.f32 %v746_v3, %v299_v61  ;;  %v606_v60 = vrot.slane %v605_v11, 1  ;;  %v705_v22 = vadd.f32 %v704_v53, %v1761_v44  ;;  %v1790_v55 = vmul.f32 %v496_v41, %v2100_v28  ;;  %v239_v53 = vpop.f32.mrf.mxu0 }
 0x114   :  { %828 = vadd.xlane.f32.xlu0 %v775_v33  ;;  %830 = vadd.xlane.f32.xlu1 %v776_v16  ;;  %v685_v51 = vadd.f32 %v684_v40, %v683_v17  ;;  %v695_v15 = vadd.f32 %v694_v0, %v693_v49  ;;  %v711_v63 = vadd.f32 %v710_v24, %v1767_v7 }
 0x115   :  { %v691_v48 = vadd.f32 %v690_v6, %v689_v18  ;;  %v701_v33 = vadd.f32 %v700_v1, %v699_v25  ;;  %v601_v54 = vadd.f32 %v600_v56, %v599_v5  ;;  %v611_v16 = vadd.f32 %v610_v21, %v609_v19  ;;  %v1088_v3 = vpop.f32.mrf.mxu0 }
 0x116   :  { %v621_v9 = vadd.f32 %v620_v57, %v1772_v58  ;;  %v763_v31 = vmul.f32 %v1750_v30, %v731_v29  ;;  %v764_v45 = vmul.f32 %v732_v35, %v229_v23  ;;  %v607_v2 = vadd.f32 %v606_v60, %v605_v11 }
 0x117   :  { %v706_v13 = vrot.slane %v705_v22, 2  ;;  %v716_v17 = vrot.slane %v1790_v55, 4  ;;  %v747_v49 = vsub.f32 %v685_v51, %v1695_v34  ;;  %v617_v27 = vadd.f32 %v616_v36, %v615_v10  ;;  %v1109_v34 = vpop.f32.mrf.mxu1  ;;  %v249_v60 = vpop.f32.mrf.mxu0 }
 0x118   :  { %800 = vadd.xlane.f32.xlu0 %v761_v20  ;;  %802 = vadd.xlane.f32.xlu1 %v762_v4  ;;  %v712_v18 = vrot.slane %v711_v63, 2  ;;  %v696_v25 = vrot.slane %v695_v15, 1  ;;  %v748_v26 = vsub.f32 %v691_v48, %v1702_v50  ;;  %v702_v5 = vrot.slane %v701_v33, 1 }
 0x119   :  { %v733_v19 = vsub.f32 %v601_v54, %v1669_v8  ;;  %v622_v30 = vrot.slane %v621_v9, 2  ;;  %v779_v29 = vmul.f32 %v1764_v37, %v747_v49  ;;  %v612_v4 = vrot.slane %v611_v16, 1  ;;  %v319_v37 = vpop.f32.mrf.mxu1 }
 0x11a   :  { %v780_v20 = vmul.f32 %v748_v26, %v309_v32  ;;  %v717_v11 = vadd.f32 %v716_v17, %v1790_v55  ;;  %v707_v0 = vadd.f32 %v706_v13, %v705_v22  ;;  %v734_v10 = vsub.f32 %v607_v2, %v1707_v62 }
 0x11b   :  { %v618_v59 = vrot.slane %v617_v27, 1  ;;  %v697_v40 = vadd.f32 %v696_v25, %v695_v15  ;;  %v703_v50 = vadd.f32 %v702_v5, %v701_v33  ;;  %v713_v61 = vadd.f32 %v712_v18, %v711_v63  ;;  %v1151_v25 = vld [vmem:[%s2062_s1 + $0x8] sm:$0xff] }
 0x11c   :  { %832 = vadd.xlane.f32.xlu0 %v777_v12  ;;  %834 = vadd.xlane.f32.xlu1 %v778_v42  ;;  %v765_v1 = vmul.f32 %v1082_v47, %v733_v19  ;;  %v766_v8 = vmul.f32 %v734_v10, %v239_v53  ;;  %v718_v41 = vrot.slane %v717_v11, 2  ;;  %v613_v24 = vadd.f32 %v612_v4, %v611_v16  ;;  %v1112_v47 = vpop.f32.mrf.mxu1 }
 0x11d   :  { %v623_v6 = vadd.f32 %v622_v30, %v621_v9  ;;  %v619_v21 = vadd.f32 %v618_v59, %v617_v27  ;;  %v749_v57 = vsub.f32 %v697_v40, %v1726_v39  ;;  %v708_v56 = vrot.slane %v707_v0, 1 }
 0x11e   :  { %v750_v35 = vsub.f32 %v703_v50, %v1733_v38  ;;  %v714_v62 = vrot.slane %v713_v61, 1  ;;  %v735_v42 = vsub.f32 %v613_v24, %v1722_v46  ;;  %v719_v15 = vadd.f32 %v718_v41, %v717_v11  ;;  %v329_v38 = vpop.f32.mrf.mxu1  ;;  %v2102_v11 = vld [vmem:[#allocation7_spill] sm:$0xff]  ;;  %v1153_v24 = vld [vmem:[%s2062_s1 + $0x18] sm:$0xff] }
 0x11f   :  { %v781_v36 = vmul.f32 %v1106_v14, %v749_v57  ;;  %v736_v22 = vsub.f32 %v619_v21, %v1742_v43  ;;  %v709_v28 = vadd.f32 %v708_v56, %v707_v0  ;;  %v624_v51 = vrot.slane %v623_v6, 1  ;;  %v1152_v0 = vld [vmem:[%s2062_s1] sm:$0xff] }
 0x120   :  { %804 = vadd.xlane.f32.xlu0 %v763_v31  ;;  %806 = vadd.xlane.f32.xlu1 %v764_v45  ;;  %v782_v12 = vmul.f32 %v750_v35, %v319_v37  ;;  %v715_v23 = vadd.f32 %v714_v62, %v713_v61  ;;  %v767_v39 = vmul.f32 %v1085_v52, %v735_v42  ;;  %v720_v14 = vrot.slane %v719_v15, 1  ;;  %v2104_v62 = vld [vmem:[#allocation8_spill] sm:$0xff] }
 0x121   :  { %v768_v63 = vmul.f32 %v736_v22, %v249_v60  ;;  %v751_v48 = vsub.f32 %v709_v28, %v1761_v44  ;;  %v625_v33 = vadd.f32 %v624_v51, %v623_v6  ;;  %v1813_v44 = vstv %s2064_s3 }
 0x122   :  { %v752_v54 = vsub.f32 %v715_v23, %v1767_v7  ;;  %v721_v9 = vadd.f32 %v720_v14, %v719_v15  ;;  %v1155_v23 = vld [vmem:[%s2062_s1 + $0x10] sm:$0xff] }
 0x123   :  { %v783_v46 = vmul.f32 %v1109_v34, %v751_v48  ;;  %v737_v43 = vsub.f32 %v625_v33, %v1772_v58 }
 0x124   :  { %836 = vadd.xlane.f32.xlu0 %v779_v29  ;;  %838 = vadd.xlane.f32.xlu1 %v780_v20  ;;  %v784_v16 = vmul.f32 %v752_v54, %v329_v38  ;;  %v753_v45 = vsub.f32 %v721_v9, %v1790_v55  ;;  %v2101_v55 = vld [vmem:[#allocation6_spill] sm:$0xff] }
 0x125   :  { %v769_v31 = vmul.f32 %v1088_v3, %v737_v43  ;;  %v1156_v43 = vld [vmem:[%s2062_s1 + $0x28] sm:$0xff] }
 0x126   :  { %v785_v2 = vmul.f32 %v1112_v47, %v753_v45 }
 0x128   :  { %808 = vadd.xlane.f32.xlu0 %v765_v1  ;;  %810 = vadd.xlane.f32.xlu1 %v766_v8  ;;  %v2103_v8 = vld [vmem:[#allocation9_spill] sm:$0xff] }
 0x12c   :  { %840 = vadd.xlane.f32.xlu0 %v781_v36  ;;  %842 = vadd.xlane.f32.xlu1 %v782_v12  ;;  %v1154_v12 = vld [vmem:[%s2062_s1 + $0x20] sm:$0xff] }
 0x130   :  { %812 = vadd.xlane.f32.xlu0 %v767_v39  ;;  %814 = vadd.xlane.f32.xlu1 %v768_v63  ;;  %v2105_v63 = vld [vmem:[#allocation10_spill] sm:$0xff] }
 0x134   :  { %844 = vadd.xlane.f32.xlu0 %v783_v46  ;;  %846 = vadd.xlane.f32.xlu1 %v784_v16 }
 0x138   :  { %816 = vadd.xlane.f32.xlu0 %v769_v31  ;;  %v1157_v31 = vld [vmem:[%s2062_s1 + $0x30] sm:$0xff] }
 0x13c   :  { %848 = vadd.xlane.f32.xlu0 %v785_v2 }
 0x185   :  { %v821_v7 = vpop.xlane.xlu0 %820  ;;  %v789_v13 = vpop.xlane.xlu1 %788 }
 0x186   :  { %v868_v17 = vadd.f32 %v1813_v44, %v821_v7  ;;  %v852_v58 = vadd.f32 %v1813_v44, %v789_v13 }
 0x188   :  { %v900_v49 = vmax.f32 %v868_v17, 0.0  ;;  %v884_v32 = vmax.f32 %v852_v58, 0.0 }
 0x189   :  { %v819_v52 = vpop.xlane.xlu1 %818  ;;  %v787_v27 = vpop.xlane.xlu0 %786 }
 0x18a   :  { %v932_v18 = vmul.f32 %v900_v49, %v2101_v55  ;;  %v916_v26 = vmul.f32 %v1151_v25, %v884_v32  ;;  %v867_v5 = vadd.f32 %v1813_v44, %v819_v52  ;;  %v851_v19 = vadd.f32 %v1813_v44, %v787_v27  ;;  %v1158_v32 = vld [vmem:[%s2062_s1 + $0xa8] sm:$0xff]  ;;  %v1159_v27 = vld [vmem:[%s2062_s1 + $0xb0] sm:$0xff] }
 0x18c   :  { %965 = vst.msk [vmem:[%s2065_s4 + $0x88] sm:$0xff] %vm947_vm0, %v932_v18  ;;  %949 = vst.msk [vmem:[%s2065_s4 + $0x8] sm:$0xff] %vm947_vm0, %v916_v26  ;;  %v899_v30 = vmax.f32 %v867_v5, 0.0  ;;  %v883_v29 = vmax.f32 %v851_v19, 0.0 }
 0x18d   :  { %v823_v20 = vpop.xlane.xlu1 %822  ;;  %v793_v4 = vpop.xlane.xlu0 %792 }
 0x18e   :  { %v931_v34 = vmul.f32 %v899_v30, %v2102_v11  ;;  %v915_v53 = vmul.f32 %v1152_v0, %v883_v29  ;;  %v869_v10 = vadd.f32 %v1813_v44, %v823_v20  ;;  %v854_v59 = vadd.f32 %v1813_v44, %v793_v4  ;;  %v1160_v29 = vld [vmem:[%s2062_s1 + $0x38] sm:$0xff]  ;;  %v1161_v4 = vld [vmem:[%s2062_s1 + $0x40] sm:$0xff] }
 0x190   :  { %964 = vst.msk [vmem:[%s2065_s4 + $0x80] sm:$0xff] %vm947_vm0, %v931_v34  ;;  %948 = vst.msk [vmem:[%s2065_s4] sm:$0xff] %vm947_vm0, %v915_v53  ;;  %v901_v40 = vmax.f32 %v869_v10, 0.0  ;;  %v886_v50 = vmax.f32 %v854_v59, 0.0 }
 0x191   :  { %v825_v61 = vpop.xlane.xlu0 %824  ;;  %v795_v1 = vpop.xlane.xlu1 %794 }
 0x192   :  { %v933_v41 = vmul.f32 %v901_v40, %v2103_v8  ;;  %v918_v37 = vmul.f32 %v1153_v24, %v886_v50  ;;  %v870_v3 = vadd.f32 %v1813_v44, %v825_v61  ;;  %v855_v6 = vadd.f32 %v1813_v44, %v795_v1  ;;  %v1162_v50 = vld [vmem:[%s2062_s1 + $0xb8] sm:$0xff]  ;;  %v1163_v1 = vld [vmem:[%s2062_s1 + $0xc0] sm:$0xff] }
 0x194   :  { %966 = vst.msk [vmem:[%s2065_s4 + $0x90] sm:$0xff] %vm947_vm0, %v933_v41  ;;  %951 = vst.msk [vmem:[%s2065_s4 + $0x18] sm:$0xff] %vm947_vm0, %v918_v37  ;;  %v902_v21 = vmax.f32 %v870_v3, 0.0  ;;  %v887_v57 = vmax.f32 %v855_v6, 0.0 }
 0x195   :  { %v791_v56 = vpop.xlane.xlu0 %790  ;;  %v827_v35 = vpop.xlane.xlu1 %826 }
 0x196   :  { %v934_v36 = vmul.f32 %v902_v21, %v2104_v62  ;;  %v919_v42 = vmul.f32 %v1154_v12, %v887_v57  ;;  %v853_v47 = vadd.f32 %v1813_v44, %v791_v56  ;;  %v871_v60 = vadd.f32 %v1813_v44, %v827_v35  ;;  %v1164_v57 = vld [vmem:[%s2062_s1 + $0x48] sm:$0xff]  ;;  %v1165_v35 = vld [vmem:[%s2062_s1 + $0x50] sm:$0xff] }
 0x198   :  { %967 = vst.msk [vmem:[%s2065_s4 + $0x98] sm:$0xff] %vm947_vm0, %v934_v36  ;;  %952 = vst.msk [vmem:[%s2065_s4 + $0x20] sm:$0xff] %vm947_vm0, %v919_v42  ;;  %v885_v22 = vmax.f32 %v853_v47, 0.0  ;;  %v903_v28 = vmax.f32 %v871_v60, 0.0 }
 0x199   :  { %v797_v51 = vpop.xlane.xlu0 %796  ;;  %v799_v15 = vpop.xlane.xlu1 %798 }
 0x19a   :  { %v917_v39 = vmul.f32 %v1155_v23, %v885_v22  ;;  %v935_v38 = vmul.f32 %v903_v28, %v2105_v63  ;;  %v856_v48 = vadd.f32 %v1813_v44, %v797_v51  ;;  %v857_v33 = vadd.f32 %v1813_v44, %v799_v15  ;;  %v1166_v28 = vld [vmem:[%s2062_s1 + $0xc8] sm:$0xff]  ;;  %v1167_v15 = vld [vmem:[%s2062_s1 + $0xd0] sm:$0xff] }
 0x19c   :  { %950 = vst.msk [vmem:[%s2065_s4 + $0x10] sm:$0xff] %vm947_vm0, %v917_v39  ;;  %968 = vst.msk [vmem:[%s2065_s4 + $0xa0] sm:$0xff] %vm947_vm0, %v935_v38  ;;  %v888_v14 = vmax.f32 %v856_v48, 0.0  ;;  %v889_v54 = vmax.f32 %v857_v33, 0.0 }
 0x19d   :  { %v829_v46 = vpop.xlane.xlu0 %828  ;;  %v831_v16 = vpop.xlane.xlu1 %830 }
 0x19e   :  { %v920_v9 = vmul.f32 %v1156_v43, %v888_v14  ;;  %v921_v45 = vmul.f32 %v1157_v31, %v889_v54  ;;  %v872_v2 = vadd.f32 %v1813_v44, %v829_v46  ;;  %v873_v7 = vadd.f32 %v1813_v44, %v831_v16  ;;  %v1168_v54 = vld [vmem:[%s2062_s1 + $0x58] sm:$0xff]  ;;  %v1169_v16 = vld [vmem:[%s2062_s1 + $0x60] sm:$0xff] }
 0x1a0   :  { %953 = vst.msk [vmem:[%s2065_s4 + $0x28] sm:$0xff] %vm947_vm0, %v920_v9  ;;  %954 = vst.msk [vmem:[%s2065_s4 + $0x30] sm:$0xff] %vm947_vm0, %v921_v45  ;;  %v904_v13 = vmax.f32 %v872_v2, 0.0  ;;  %v905_v17 = vmax.f32 %v873_v7, 0.0 }
 0x1a1   :  { %v801_v58 = vpop.xlane.xlu0 %800  ;;  %v803_v49 = vpop.xlane.xlu1 %802 }
 0x1a2   :  { %v936_v52 = vmul.f32 %v1158_v32, %v904_v13  ;;  %v937_v55 = vmul.f32 %v1159_v27, %v905_v17  ;;  %v858_v18 = vadd.f32 %v1813_v44, %v801_v58  ;;  %v859_v25 = vadd.f32 %v1813_v44, %v803_v49  ;;  %v1170_v17 = vld [vmem:[%s2062_s1 + $0xd8] sm:$0xff]  ;;  %v1171_v49 = vld [vmem:[%s2062_s1 + $0xe0] sm:$0xff] }
 0x1a4   :  { %969 = vst.msk [vmem:[%s2065_s4 + $0xa8] sm:$0xff] %vm947_vm0, %v936_v52  ;;  %970 = vst.msk [vmem:[%s2065_s4 + $0xb0] sm:$0xff] %vm947_vm0, %v937_v55  ;;  %v890_v26 = vmax.f32 %v858_v18, 0.0  ;;  %v891_v5 = vmax.f32 %v859_v25, 0.0 }
 0x1a5   :  { %v833_v19 = vpop.xlane.xlu0 %832  ;;  %v835_v30 = vpop.xlane.xlu1 %834 }
 0x1a6   :  { %v922_v20 = vmul.f32 %v1160_v29, %v890_v26  ;;  %v923_v11 = vmul.f32 %v1161_v4, %v891_v5  ;;  %v874_v34 = vadd.f32 %v1813_v44, %v833_v19  ;;  %v875_v0 = vadd.f32 %v1813_v44, %v835_v30  ;;  %v1172_v5 = vld [vmem:[%s2062_s1 + $0x68] sm:$0xff]  ;;  %v1173_v30 = vld [vmem:[%s2062_s1 + $0x70] sm:$0xff] }
 0x1a8   :  { %955 = vst.msk [vmem:[%s2065_s4 + $0x38] sm:$0xff] %vm947_vm0, %v922_v20  ;;  %956 = vst.msk [vmem:[%s2065_s4 + $0x40] sm:$0xff] %vm947_vm0, %v923_v11  ;;  %v906_v53 = vmax.f32 %v874_v34, 0.0  ;;  %v907_v10 = vmax.f32 %v875_v0, 0.0 }
 0x1a9   :  { %v805_v59 = vpop.xlane.xlu0 %804  ;;  %v807_v40 = vpop.xlane.xlu1 %806 }
 0x1aa   :  { %v938_v61 = vmul.f32 %v1162_v50, %v906_v53  ;;  %v939_v8 = vmul.f32 %v1163_v1, %v907_v10  ;;  %v860_v41 = vadd.f32 %v1813_v44, %v805_v59  ;;  %v861_v24 = vadd.f32 %v1813_v44, %v807_v40  ;;  %v1174_v53 = vld [vmem:[%s2062_s1 + $0xe8] sm:$0xff]  ;;  %v1175_v59 = vld [vmem:[%s2062_s1 + $0xf0] sm:$0xff] }
 0x1ac   :  { %971 = vst.msk [vmem:[%s2065_s4 + $0xb8] sm:$0xff] %vm947_vm0, %v938_v61  ;;  %972 = vst.msk [vmem:[%s2065_s4 + $0xc0] sm:$0xff] %vm947_vm0, %v939_v8  ;;  %v892_v37 = vmax.f32 %v860_v41, 0.0  ;;  %v893_v3 = vmax.f32 %v861_v24, 0.0  ;;  %v1176_v8 = vld [vmem:[%s2062_s1 + $0x78] sm:$0xff] }
 0x1ad   :  { %v837_v6 = vpop.xlane.xlu0 %836  ;;  %v839_v21 = vpop.xlane.xlu1 %838 }
 0x1ae   :  { %v924_v56 = vmul.f32 %v1164_v57, %v892_v37  ;;  %v925_v62 = vmul.f32 %v1165_v35, %v893_v3  ;;  %v876_v36 = vadd.f32 %v1813_v44, %v837_v6  ;;  %v877_v12 = vadd.f32 %v1813_v44, %v839_v21  ;;  %v1177_v3 = vld [vmem:[%s2062_s1 + $0xf8] sm:$0xff] }
 0x1b0   :  { %957 = vst.msk [vmem:[%s2065_s4 + $0x48] sm:$0xff] %vm947_vm0, %v924_v56  ;;  %958 = vst.msk [vmem:[%s2065_s4 + $0x50] sm:$0xff] %vm947_vm0, %v925_v62  ;;  %v908_v42 = vmax.f32 %v876_v36, 0.0  ;;  %v909_v47 = vmax.f32 %v877_v12, 0.0 }
 0x1b1   :  { %v809_v60 = vpop.xlane.xlu0 %808  ;;  %v811_v22 = vpop.xlane.xlu1 %810 }
 0x1b2   :  { %v940_v51 = vmul.f32 %v1166_v28, %v908_v42  ;;  %v941_v23 = vmul.f32 %v1167_v15, %v909_v47  ;;  %v862_v39 = vadd.f32 %v1813_v44, %v809_v60  ;;  %v863_v63 = vadd.f32 %v1813_v44, %v811_v22 }
 0x1b4   :  { %973 = vst.msk [vmem:[%s2065_s4 + $0xc8] sm:$0xff] %vm947_vm0, %v940_v51  ;;  %974 = vst.msk [vmem:[%s2065_s4 + $0xd0] sm:$0xff] %vm947_vm0, %v941_v23  ;;  %v894_v38 = vmax.f32 %v862_v39, 0.0  ;;  %v895_v48 = vmax.f32 %v863_v63, 0.0 }
 0x1b5   :  { %v841_v33 = vpop.xlane.xlu0 %840  ;;  %v843_v14 = vpop.xlane.xlu1 %842 }
 0x1b6   :  { %v926_v46 = vmul.f32 %v1168_v54, %v894_v38  ;;  %v927_v43 = vmul.f32 %v1169_v16, %v895_v48  ;;  %v878_v9 = vadd.f32 %v1813_v44, %v841_v33  ;;  %v879_v31 = vadd.f32 %v1813_v44, %v843_v14 }
 0x1b8   :  { %959 = vst.msk [vmem:[%s2065_s4 + $0x58] sm:$0xff] %vm947_vm0, %v926_v46  ;;  %960 = vst.msk [vmem:[%s2065_s4 + $0x60] sm:$0xff] %vm947_vm0, %v927_v43  ;;  %v910_v45 = vmax.f32 %v878_v9, 0.0  ;;  %v911_v2 = vmax.f32 %v879_v31, 0.0 }
 0x1b9   :  { %v813_v7 = vpop.xlane.xlu0 %812  ;;  %v815_v13 = vpop.xlane.xlu1 %814 }
 0x1ba   :  { %v942_v58 = vmul.f32 %v1170_v17, %v910_v45  ;;  %v943_v32 = vmul.f32 %v1171_v49, %v911_v2  ;;  %v864_v52 = vadd.f32 %v1813_v44, %v813_v7  ;;  %v865_v27 = vadd.f32 %v1813_v44, %v815_v13 }
 0x1bc   :  { %975 = vst.msk [vmem:[%s2065_s4 + $0xd8] sm:$0xff] %vm947_vm0, %v942_v58  ;;  %976 = vst.msk [vmem:[%s2065_s4 + $0xe0] sm:$0xff] %vm947_vm0, %v943_v32  ;;  %v896_v55 = vmax.f32 %v864_v52, 0.0  ;;  %v897_v18 = vmax.f32 %v865_v27, 0.0 }
 0x1bd   :  { %v845_v25 = vpop.xlane.xlu0 %844  ;;  %v847_v26 = vpop.xlane.xlu1 %846 }
 0x1be   :  { %v928_v19 = vmul.f32 %v1172_v5, %v896_v55  ;;  %v929_v29 = vmul.f32 %v1173_v30, %v897_v18  ;;  %v880_v20 = vadd.f32 %v1813_v44, %v845_v25  ;;  %v881_v4 = vadd.f32 %v1813_v44, %v847_v26 }
 0x1c0   :  { %961 = vst.msk [vmem:[%s2065_s4 + $0x68] sm:$0xff] %vm947_vm0, %v928_v19  ;;  %962 = vst.msk [vmem:[%s2065_s4 + $0x70] sm:$0xff] %vm947_vm0, %v929_v29  ;;  %v912_v11 = vmax.f32 %v880_v20, 0.0  ;;  %v913_v34 = vmax.f32 %v881_v4, 0.0 }
 0x1c1   :  { %v817_v0 = vpop.xlane.xlu0 %816 }
 0x1c2   :  { %v944_v10 = vmul.f32 %v1174_v53, %v912_v11  ;;  %v945_v40 = vmul.f32 %v1175_v59, %v913_v34  ;;  %v866_v50 = vadd.f32 %v1813_v44, %v817_v0 }
 0x1c4   :  { %977 = vst.msk [vmem:[%s2065_s4 + $0xe8] sm:$0xff] %vm947_vm0, %v944_v10  ;;  %978 = vst.msk [vmem:[%s2065_s4 + $0xf0] sm:$0xff] %vm947_vm0, %v945_v40  ;;  %v898_v61 = vmax.f32 %v866_v50, 0.0 }
 0x1c5   :  { %v849_v1 = vpop.xlane.xlu0 %848 }
 0x1c6   :  { %v930_v41 = vmul.f32 %v1176_v8, %v898_v61  ;;  %v882_v24 = vadd.f32 %v1813_v44, %v849_v1 }
 0x1c8   :  { %963 = vst.msk [vmem:[%s2065_s4 + $0x78] sm:$0xff] %vm947_vm0, %v930_v41  ;;  %v914_v37 = vmax.f32 %v882_v24, 0.0 }
 0x1ca   :  { %v946_v6 = vmul.f32 %v1177_v3, %v914_v37 }
 0x1cc   :  { %979 = vst.msk [vmem:[%s2065_s4 + $0xf8] sm:$0xff] %vm947_vm0, %v946_v6 }
 0x1cd   :  { %984 = vsyncpa [#allocation4], 1 }

</bundles_post_ra>
